<compile_context>
chip_gen: v7x
topology: tpu7x:2x2x1
jax: 0.10.0
libtpu: 0.0.40
codegen_flags: <defaults>
</compile_context>

<pallas_src>
import math

import jax
import jax.numpy as jnp
from jax.experimental import pallas as pl
from jax.experimental.pallas import tpu as pltpu


_LANES = 128
_SUBLANES = 8
_MAX_TM = 2048                      # packed rows per tile (amortizes grid overhead)
_VMEM_BUDGET = 12 * 1024 * 1024     # conservative: fits v5e's 16 MiB scoped default
_VMEM_LIMIT = 32 * 1024 * 1024      # explicit scoped-VMEM limit (safe v5e..v7x)


def _round_up(x, m):
    return ((x + m - 1) // m) * m


def _pack_factor(in_dim, out_dim):
    """Logical rows folded per 128-lane row so both x and y are lane dense."""
    pi = _LANES // math.gcd(_LANES, in_dim)
    po = _LANES // math.gcd(_LANES, out_dim)
    p = pi * po // math.gcd(pi, po)  # lcm
    # Only pack when it buys lane density and keeps the block-diag weight small.
    if p == 1 or p * in_dim > 512 or p * out_dim > 512:
        return 1
    return p


def _derive_tm(m_rows, lin, lout, itemsize):
    """Largest row tile fitting the VMEM budget (x, y double-buffered)."""
    fixed = 2 * (lin * lout + lout) * itemsize           # weight + bias (2 buffers)
    per_row = 2 * (lin + lout) * itemsize                # x + y tiles, double-buffered
    tm = max(_SUBLANES, (_VMEM_BUDGET - fixed) // per_row)
    tm = min(tm, _MAX_TM)
    tm = max(_SUBLANES, (tm // _SUBLANES) * _SUBLANES)
    m_aligned = _round_up(m_rows, _SUBLANES)
    tm = min(tm, m_aligned)                              # don't exceed the data
    # Split a single-tile problem into 2 grid steps only when it is large
    # enough that the per-step overhead is noise (v7x megacore load balance).
    if m_aligned <= tm and m_rows >= 1024:
        tm = _round_up(pl.cdiv(m_rows, 2), _SUBLANES)
    return tm


def _linear_kernel(x_ref, w_ref, b_ref, o_ref):
    # x_ref: (tm, Lin), w_ref: (Lin, Lout), b_ref: (1, Lout), o_ref: (tm, Lout)
    acc = jnp.dot(x_ref[...], w_ref[...], preferred_element_type=jnp.float32)
    o_ref[...] = (acc + b_ref[...]).astype(o_ref.dtype)


@jax.jit
def header_concat_mlp(x, weight, bias):
    """y = x @ weight.T + bias   (torch.nn.Linear semantics).

    x:      (..., in_dim)
    weight: (out_dim, in_dim)   -- nn.Linear layout
    bias:   (out_dim,)
    """
    *lead, in_dim = x.shape
    out_dim = weight.shape[0]
    m = int(math.prod(lead)) if lead else 1
    dtype = x.dtype
    itemsize = jnp.dtype(dtype).itemsize

    p = _pack_factor(in_dim, out_dim)
    lin, lout = p * in_dim, p * out_dim

    # ---- wrapper-side layout plumbing (reshapes + tiny one-time weight prep) ----
    x2 = x.reshape(m, in_dim)
    m_pad = _round_up(m, p * _SUBLANES)                   # fold evenly, 8-row aligned
    if m_pad != m:
        x2 = jnp.pad(x2, ((0, m_pad - m), (0, 0)))
    m_rows = m_pad // p
    xp = x2.reshape(m_rows, lin)                          # lane-dense input slab
    w_t = jnp.transpose(weight).astype(dtype)             # (in_dim, out_dim)
    if p > 1:
        wp = jnp.kron(jnp.eye(p, dtype=dtype), w_t)       # block-diag (Lin, Lout)
        bp = jnp.tile(bias.astype(dtype), p).reshape(1, lout)
    else:
        wp = w_t
        bp = bias.astype(dtype).reshape(1, lout)

    tm = _derive_tm(m_rows, lin, lout, itemsize)
    grid = (pl.cdiv(m_rows, tm),)

    cost = pl.CostEstimate(
        flops=2 * m_rows * lin * lout,
        bytes_accessed=itemsize * (m_rows * lin + lin * lout + lout + m_rows * lout),
        transcendentals=0,
    )

    out_p = pl.pallas_call(
        _linear_kernel,
        out_shape=jax.ShapeDtypeStruct((m_rows, lout), dtype),
        grid_spec=pltpu.PrefetchScalarGridSpec(
            num_scalar_prefetch=0,
            grid=grid,
            in_specs=[
                pl.BlockSpec((tm, lin), lambda i: (i, 0)),
                pl.BlockSpec((lin, lout), lambda i: (0, 0)),   # constant -> fetched once
                pl.BlockSpec((1, lout), lambda i: (0, 0)),
            ],
            out_specs=pl.BlockSpec((tm, lout), lambda i: (i, 0)),
        ),
        compiler_params=pltpu.CompilerParams(
            dimension_semantics=("parallel",),
            vmem_limit_bytes=_VMEM_LIMIT,
        ),
        cost_estimate=cost,
    )(xp, wp, bp)

    y = out_p.reshape(m_pad, out_dim)[:m]
    return y.reshape(*lead, out_dim)


if __name__ == "__main__":
    # HeaderConcatMLP(in_dim=32, out_dim=32) with initialize_weights_ones().
    in_dim, out_dim = 32, 32
    B, T = 2, 8

    weight = jnp.ones((out_dim, in_dim), dtype=jnp.float32)   # nn.Linear layout
    bias = jnp.ones((out_dim,), dtype=jnp.float32)

    key = jax.random.PRNGKey(0)
    x = jax.random.normal(key, (B, T, in_dim), dtype=jnp.float32)

    y = jax.block_until_ready(header_concat_mlp(x, weight, bias))
    y_ref = x @ weight.T + bias
    assert y.shape == (B, T, out_dim)
    assert jnp.allclose(y, y_ref, atol=1e-5, rtol=1e-5)

    # Second check: exercises the multi-step (grid > 1) path.
    x_big = jax.random.normal(jax.random.PRNGKey(1), (4, 1024, in_dim), dtype=jnp.float32)
    y_big = jax.block_until_ready(header_concat_mlp(x_big, weight, bias))
    y_big_ref = x_big @ weight.T + bias
    assert jnp.allclose(y_big, y_big_ref, atol=1e-4, rtol=1e-5)

    print("KERNEL_OK")
</pallas_src>

<mosaic_0001>
module attributes {stable_mosaic.version = 11 : i64} {
  func.func @_linear_kernel(%arg0: i32, %arg1: memref<8x128xf32, #tpu.memory_space<vmem>>, %arg2: memref<128x128xf32, #tpu.memory_space<vmem>>, %arg3: memref<1x128xf32, #tpu.memory_space<vmem>>, %arg4: memref<8x128xf32, #tpu.memory_space<vmem>>) attributes {dimension_semantics = [#tpu.dimension_semantics<parallel>], iteration_bounds = array<i64: 1>, scalar_prefetch = 0 : i64, scratch_operands = 0 : i64, tpu.core_type = #tpu.core_type<tc>, window_params = [{transform_indices = @transform_0, window_bounds = array<i64: 8, 128>}, {pipeline_mode = #tpu.pipeline_mode<synchronous>, transform_indices = @transform_1, window_bounds = array<i64: 128, 128>}, {pipeline_mode = #tpu.pipeline_mode<synchronous>, transform_indices = @transform_2, window_bounds = array<i64: 1, 128>}, {transform_indices = @transform_3, window_bounds = array<i64: 8, 128>}]} {
    %c0 = arith.constant 0 : index
    %c0_0 = arith.constant 0 : index
    %0 = vector.load %arg1[%c0, %c0_0] : memref<8x128xf32, #tpu.memory_space<vmem>>, vector<8x128xf32>
    %c0_1 = arith.constant 0 : index
    %c0_2 = arith.constant 0 : index
    %1 = vector.load %arg2[%c0_1, %c0_2] : memref<128x128xf32, #tpu.memory_space<vmem>>, vector<128x128xf32>
    %cst = arith.constant dense<0.000000e+00> : vector<8x128xf32>
    %2 = tpu.matmul %0, %1, %cst {dimension_numbers = #tpu.dot_dimension_numbers<[1], [0], [0], [1], [0, 0, 1, 1], [], []>} : vector<8x128xf32>, vector<128x128xf32>, vector<8x128xf32> -> vector<8x128xf32>
    %c0_3 = arith.constant 0 : index
    %c0_4 = arith.constant 0 : index
    %3 = vector.load %arg3[%c0_3, %c0_4] : memref<1x128xf32, #tpu.memory_space<vmem>>, vector<1x128xf32>
    %4 = vector.broadcast %3 : vector<1x128xf32> to vector<8x128xf32>
    %5 = arith.addf %2, %4 : vector<8x128xf32>
    %c0_5 = arith.constant 0 : index
    %c0_6 = arith.constant 0 : index
    %6 = vector.load %arg4[%c0_5, %c0_6] : memref<8x128xf32, #tpu.memory_space<vmem>>, vector<8x128xf32>
    tpu.vector_store %arg4[%c0_5, %c0_6], %5 {strides = array<i32>} : memref<8x128xf32, #tpu.memory_space<vmem>>, vector<8x128xf32>,
    return
  }
  func.func @transform_0(%arg0: i32) -> (i32, i32) {
    %c0_i32 = arith.constant 0 : i32
    %c0_i32_0 = arith.constant 0 : i32
    return %arg0, %c0_i32 : i32, i32
  }
  func.func @transform_1(%arg0: i32) -> (i32, i32) {
    %c0_i32 = arith.constant 0 : i32
    %c0_i32_0 = arith.constant 0 : i32
    %c0_i32_1 = arith.constant 0 : i32
    return %c0_i32, %c0_i32_0 : i32, i32
  }
  func.func @transform_2(%arg0: i32) -> (i32, i32) {
    %c0_i32 = arith.constant 0 : i32
    %c0_i32_0 = arith.constant 0 : i32
    %c0_i32_1 = arith.constant 0 : i32
    return %c0_i32, %c0_i32_0 : i32, i32
  }
  func.func @transform_3(%arg0: i32) -> (i32, i32) {
    %c0_i32 = arith.constant 0 : i32
    %c0_i32_0 = arith.constant 0 : i32
    return %arg0, %c0_i32 : i32, i32
  }
}

</mosaic_0001>

<bundles_post_ra>
// kernel: tile.8
= control target key start
LH: loop header
LB: loop body
LE: loop exit
PB: predicated region body
PF: predicated region fallthrough
CT: control target
= control target key end

     0   :  { %s22_s0 = inlined_call_operand.vmem [shape: f32[32], index: 0, kind: input, shape index: {}]   ;;  %s23_s1 = inlined_call_operand.vmem [shape: f32[4,32], index: 1, kind: output, shape index: {}]  }
   0x1   :  { %v4_v0 = vld [vmem:[%s22_s0] ss:$0 sm:$0xff] }
   0x2   :  { %5 = vst [vmem:[%s23_s1] sm:$0xf] %v4_v0 }

// kernel: tile.9
= control target key start
LH: loop header
LB: loop body
LE: loop exit
PB: predicated region body
PF: predicated region fallthrough
CT: control target
= control target key end

     0   :  { %vm7_vm0 = vcmask 261120   ;;  %s37_s8 = smov 32   ;;  %s38_s9 = smov 64   ;;  %vm13_vm1 = vcmask 1048320   ;;  %vm19_vm2 = vcmask 785920   ;;  %vm25_vm3 = vcmask 523520   ;;  %s55_s0 = inlined_call_operand.vmem [shape: f32[4,32], index: 0, kind: input, shape index: {}]   ;;  %s56_s1 = inlined_call_operand.vmem [shape: f32[1,128], index: 1, kind: output, shape index: {}]  }
   0x1   :  { %v4_v0 = vld [vmem:[%s55_s0] sm:$0xf]  ;;  %s36_s0 = smov 96  }
   0x2   :  { %5 = vst [vmem:[#allocation1] sm:$0xf] %v4_v0 }
   0x9   :  { %v10_v1 = vld [vmem:[#allocation1 + $0x3] sm:$0x1]   ;;  %v22_v2 = vld [vmem:[#allocation1 + $0x1] sm:$0x1]   ;;  %v6_v3 = vld [vmem:[#allocation1] sm:$0x1]  }
   0xa   :  { %11 = vrot.lane.b32.xlu0 %v10_v1, %s36_s0  ;;  %23 = vrot.lane.b32.xlu1 %v22_v2, %s37_s8  ;;  %v16_v4 = vld [vmem:[#allocation1 + $0x2] sm:$0x1]   ;;  %8 = vst.msk [vmem:[#allocation0] sm:$0x1] %vm7_vm0, %v6_v3  }
   0xe   :  { %17 = vrot.lane.b32.xlu0 %v16_v4, %s38_s9 }
  0x7c   :  { %v12_v5 = vpop.permute.xlu0 %11   ;;  %v24_v6 = vpop.permute.xlu1 %23  }
  0x7d   :  { %14 = vst.msk [vmem:[#allocation0] sm:$0x1] %vm13_vm1, %v12_v5  }
  0x80   :  { %v18_v7 = vpop.permute.xlu0 %17  }
  0x81   :  { %20 = vst.msk [vmem:[#allocation0] sm:$0x1] %vm19_vm2, %v18_v7  }
  0x82   :  { %26 = vst.msk [vmem:[#allocation0] sm:$0x1] %vm25_vm3, %v24_v6  }
  0x89   :  { %v30_v8 = vld [vmem:[#allocation0] sm:$0x1] }
  0x8a   :  { %32 = vst [vmem:[%s56_s1] sm:$0x1] %v30_v8 }

// kernel: header_concat_mlp.1
= control target key start
LH: loop header
LB: loop body
LE: loop exit
PB: predicated region body
PF: predicated region fallthrough
CT: control target
= control target key end

     0   :  { %v193_v0 = vmov 0.0|0.0   ;;  %vm194_vm0 = vmmov 0   ;;  %v195_v4 = vmov 0.0   ;;  %s273_s1 = inlined_call_operand.vmem [shape: f32[128,128], index: 1, kind: input, shape index: {}]   ;;  %s274_s0 = inlined_call_operand.vmem [shape: f32[8,128], index: 0, kind: input, shape index: {}]   ;;  %s275_s2 = inlined_call_operand.vmem [shape: f32[1,128], index: 2, kind: input, shape index: {}]   ;;  %s276_s3 = inlined_call_operand.vmem [shape: f32[8,128], index: 3, kind: output, shape index: {}]  }
   0x1   :  { %166 = vmatprep.subr.bf16.mxu0 %v193_v0  ;;  %v15_v1 = vld [vmem:[%s273_s1] sm:$0xff]  ;;  %v16_v2 = vld [vmem:[%s273_s1 + $0x8] sm:$0xff]  ;;  %v17_v3 = vld [vmem:[%s273_s1 + $0x10] sm:$0xff]  ;;  %163 = vmatprep.mubr.msk.f32.mxu0 %vm194_vm0, %v195_v4 }
   0x2   :  { %v167_v5 = vpack.c.bf16 %v16_v2, %v15_v1  ;;  %v18_v6 = vld [vmem:[%s273_s1 + $0x18] sm:$0xff]  ;;  %v19_v8 = vld [vmem:[%s273_s1 + $0x20] sm:$0xff]  ;;  %v20_v9 = vld [vmem:[%s273_s1 + $0x28] sm:$0xff] }
   0x3   :  { %v170_v7 = vpack.c.bf16 %v18_v6, %v17_v3  ;;  %v173_v10 = vpack.c.bf16 %v20_v9, %v19_v8  ;;  %v21_v11 = vld [vmem:[%s273_s1 + $0x30] sm:$0xff]  ;;  %v22_v12 = vld [vmem:[%s273_s1 + $0x38] sm:$0xff]  ;;  %v23_v14 = vld [vmem:[%s273_s1 + $0x40] sm:$0xff] }
   0x4   :  { %168 = vmatpush3.bf16.msra.mxu0 %v167_v5  ;;  %v176_v13 = vpack.c.bf16 %v22_v12, %v21_v11  ;;  %v24_v15 = vld [vmem:[%s273_s1 + $0x48] sm:$0xff]  ;;  %v25_v17 = vld [vmem:[%s273_s1 + $0x50] sm:$0xff]  ;;  %v26_v18 = vld [vmem:[%s273_s1 + $0x58] sm:$0xff] }
   0x5   :  { %169 = vmatprep.subr.bf16.mxu0 %v193_v0  ;;  %v179_v16 = vpack.c.bf16 %v24_v15, %v23_v14  ;;  %v182_v19 = vpack.c.bf16 %v26_v18, %v25_v17  ;;  %v27_v20 = vld [vmem:[%s273_s1 + $0x60] sm:$0xff]  ;;  %v28_v21 = vld [vmem:[%s273_s1 + $0x68] sm:$0xff]  ;;  %v29_v23 = vld [vmem:[%s273_s1 + $0x70] sm:$0xff] }
   0x6   :  { %v185_v22 = vpack.c.bf16 %v28_v21, %v27_v20  ;;  %v30_v24 = vld [vmem:[%s273_s1 + $0x78] sm:$0xff]  ;;  %v14_v26 = vld [vmem:[%s274_s0] sm:$0xff] }
   0x7   :  { %v188_v25 = vpack.c.bf16 %v30_v24, %v29_v23  ;;  %v113_v27 = vld [vmem:[%s275_s2] ss:$0 sm:$0xff] }
   0x8   :  { %171 = vmatpush3.bf16.msra.mxu0 %v170_v7 }
   0x9   :  { %172 = vmatprep.subr.bf16.mxu0 %v193_v0 }
   0xc   :  { %174 = vmatpush3.bf16.msra.mxu0 %v173_v10 }
   0xd   :  { %175 = vmatprep.subr.bf16.mxu0 %v193_v0 }
  0x10   :  { %177 = vmatpush3.bf16.msra.mxu0 %v176_v13 }
  0x11   :  { %178 = vmatprep.subr.bf16.mxu0 %v193_v0 }
  0x14   :  { %180 = vmatpush3.bf16.msra.mxu0 %v179_v16 }
  0x15   :  { %181 = vmatprep.subr.bf16.mxu0 %v193_v0 }
  0x18   :  { %183 = vmatpush3.bf16.msra.mxu0 %v182_v19 }
  0x19   :  { %184 = vmatprep.subr.bf16.mxu0 %v193_v0 }
  0x1c   :  { %186 = vmatpush3.bf16.msra.mxu0 %v185_v22 }
  0x1d   :  { %187 = vmatprep.subr.bf16.mxu0 %v193_v0 }
  0x20   :  { %189 = vmatpush3.bf16.msra.mxu0 %v188_v25 }
  0x23   :  { %164 = vmatmul.mubr.f32.vlgmr.msra.gmra.mrb[0].mxu0 %v14_v26 }
  0xf6   :  { %v104_v28 = vpop.f32.mrb[0].mxu0 }
  0xf7   :  { %v105_v29 = vadd.f32 %v113_v27, %v104_v28  ;;  %v165_v30 = vpop.f32.mrb[1].mxu0 }
  0xf9   :  { %108 = vst [vmem:[%s276_s3] sm:$0xff] %v105_v29 }

</bundles_post_ra>
